<compile_context>
chip_gen: v5e
topology: v5e:2x2
jax: 0.10.0
libtpu: 0.0.40
codegen_flags: <defaults>
</compile_context>

<pallas_src>
import jax
import jax.numpy as jnp
from jax import lax
from jax.experimental import pallas as pl
from jax.experimental.pallas import tpu as pltpu


HIDDEN = 16
OUT = 26

# Fully unroll the serial time loop up to this many steps; beyond that use
# lax.fori_loop with a modest unroll factor (review feedback: bound live
# ranges / compile time for long sequences).
_UNROLL_T_MAX = 32

# Batch tile width (lane-dense: 2 x 128 lanes).  Sized well within v7x's
# 64 MiB VMEM even for long sequences, since only x (T, 256) f32 tiles are
# double-buffered.
_B_TILE = 256


def rnn_kernel(x_ref, params_ref, out_ref):
    # x_ref:      (T, Bt)        time-major input, batch on the lane axis
    # params_ref: (H+O, H+2)     packed parameters (single DMA):
    #               [0:H,   0:H] = W_hh        (H, H)
    #               [H:H+O, 0:H] = W_out       (O, H)
    #               [0:H,   H  ] = w_ih column (H,)
    #               [0:H,   H+1] = b_ih + b_hh (H,)
    #               [H:H+O, H  ] = b_out       (O,)
    # out_ref:    (O, Bt)
    T = x_ref.shape[0]
    H, O = HIDDEN, OUT

    # ---- loop-invariant parameter loads (hoisted, static slices) -----------
    w_hh = params_ref[0:H, 0:H]                 # (H, H)
    w_out = params_ref[H:H + O, 0:H]            # (O, H)
    w_ih = params_ref[0:H, H:H + 1]             # (H, 1)
    b = params_ref[0:H, H + 1:H + 2]            # (H, 1)  fused b_ih + b_hh
    b_out = params_ref[H:H + O, H:H + 1]        # (O, 1)

    def pre(t):
        # Pre-activation for step t: outer(w_ih, x[t, :]) + fused bias.
        # x row is (1, Bt); broadcast against the (H, 1) columns -> (H, Bt).
        # Independent of h, so the scheduler keeps it off the serial path.
        return x_ref[pl.ds(t, 1), :] * w_ih + b

    def step(t, h):
        return jnp.tanh(
            pre(t) + jnp.dot(w_hh, h, preferred_element_type=jnp.float32)
        )

    # h_{-1} == 0  =>  h_0 = tanh(pre(0)); recurrence matmul skipped at t=0.
    h = jnp.tanh(pre(0))                        # (H, Bt)

    if T <= _UNROLL_T_MAX:
        # Short sequence: full static unroll (cross-step LLO visibility).
        for t in range(1, T):
            h = step(t, h)
    else:
        # Long sequence: bounded unroll to cap vreg pressure / compile time.
        h = lax.fori_loop(1, T, step, h, unroll=8)

    # ---- output head: Linear(16, 26) on the last hidden state --------------
    out_ref[...] = (
        jnp.dot(w_out, h, preferred_element_type=jnp.float32) + b_out
    )


def rnn_forward(x, w_ih, w_hh, b_ih, b_hh, w_out, b_out):
    """x: (B, T, 1) float32 (PyTorch batch_first layout). Returns (B, 26)."""
    B, T, I = x.shape
    assert I == 1
    H, O = HIDDEN, OUT

    # Dense, time-major 2-D layout: (T, B) with batch on the 128-lane axis.
    x_tb = jnp.transpose(x[..., 0], (1, 0)).astype(jnp.float32)      # (T, B)

    # Pack all parameters into a single (H+O, H+2) operand -> one DMA.
    params = jnp.zeros((H + O, H + 2), jnp.float32)
    params = params.at[0:H, 0:H].set(w_hh.astype(jnp.float32))
    params = params.at[H:H + O, 0:H].set(w_out.astype(jnp.float32))
    params = params.at[0:H, H].set(w_ih[:, 0].astype(jnp.float32))
    params = params.at[0:H, H + 1].set((b_ih + b_hh).astype(jnp.float32))
    params = params.at[H:H + O, H].set(b_out.astype(jnp.float32))

    # Batch tiling: gridless for small B; 256-lane "parallel" tiles for large
    # B so v7x's second TensorCore gets used.
    if B > _B_TILE:
        bt = _B_TILE
        b_pad = ((B + bt - 1) // bt) * bt
        x_tb = jnp.pad(x_tb, ((0, 0), (0, b_pad - B)))
    else:
        bt = B
        b_pad = B
    grid = (b_pad // bt,)

    out_tb = pl.pallas_call(
        rnn_kernel,
        out_shape=jax.ShapeDtypeStruct((O, b_pad), jnp.float32),
        grid=grid,
        in_specs=[
            pl.BlockSpec((T, bt), lambda i: (0, i)),          # x tile
            pl.BlockSpec((H + O, H + 2), lambda i: (0, 0)),   # packed params
        ],
        out_specs=pl.BlockSpec((O, bt), lambda i: (0, i)),
        compiler_params=pltpu.CompilerParams(
            dimension_semantics=("parallel",)
        ),
    )(x_tb, params)

    # (O, B) -> (B, O), dropping any batch padding.
    return jnp.transpose(out_tb[:, :B], (1, 0))


def rnn_reference(x, w_ih, w_hh, b_ih, b_hh, w_out, b_out):
    """Pure-JAX replica of the PyTorch forward pass, for validation."""
    B, T, _ = x.shape
    h = jnp.zeros((B, HIDDEN), dtype=jnp.float32)
    for t in range(T):
        h = jnp.tanh(x[:, t, :] @ w_ih.T + b_ih + h @ w_hh.T + b_hh)
    return h @ w_out.T + b_out


if __name__ == "__main__":
    key = jax.random.PRNGKey(0)
    k_x, k1, k2, k3, k4, k5, k6, k_x2 = jax.random.split(key, 8)

    B, T = 2, 8

    # Deterministic parameter init (PyTorch-style uniform(-1/sqrt(H), 1/sqrt(H))).
    bound = 1.0 / (HIDDEN ** 0.5)
    w_ih = jax.random.uniform(k1, (HIDDEN, 1), jnp.float32, -bound, bound)
    w_hh = jax.random.uniform(k2, (HIDDEN, HIDDEN), jnp.float32, -bound, bound)
    b_ih = jax.random.uniform(k3, (HIDDEN,), jnp.float32, -bound, bound)
    b_hh = jax.random.uniform(k4, (HIDDEN,), jnp.float32, -bound, bound)
    w_out = jax.random.uniform(k5, (OUT, HIDDEN), jnp.float32, -bound, bound)
    b_out = jax.random.uniform(k6, (OUT,), jnp.float32, -bound, bound)

    # --- small-batch (gridless) path, matching the module's typical input ---
    x = jax.random.normal(k_x, (B, T, 1), dtype=jnp.float32)
    out = jax.block_until_ready(
        rnn_forward(x, w_ih, w_hh, b_ih, b_hh, w_out, b_out)
    )
    ref = rnn_reference(x, w_ih, w_hh, b_ih, b_hh, w_out, b_out)
    assert out.shape == (B, OUT), out.shape
    assert jnp.allclose(out, ref, atol=1e-5, rtol=1e-5), (
        "mismatch vs reference (small batch): max abs err "
        f"{float(jnp.max(jnp.abs(out - ref)))}"
    )

    # --- batched path: exercises the 256-lane "parallel" batch grid ---------
    B2 = 300
    x2 = jax.random.normal(k_x2, (B2, T, 1), dtype=jnp.float32)
    out2 = jax.block_until_ready(
        rnn_forward(x2, w_ih, w_hh, b_ih, b_hh, w_out, b_out)
    )
    ref2 = rnn_reference(x2, w_ih, w_hh, b_ih, b_hh, w_out, b_out)
    assert out2.shape == (B2, OUT), out2.shape
    assert jnp.allclose(out2, ref2, atol=1e-5, rtol=1e-5), (
        "mismatch vs reference (batched/grid): max abs err "
        f"{float(jnp.max(jnp.abs(out2 - ref2)))}"
    )

    print("KERNEL_OK")
</pallas_src>

<mosaic_0001>
module attributes {stable_mosaic.version = 11 : i64} {
  func.func @rnn_kernel(%arg0: i32, %arg1: memref<8x2xf32, #tpu.memory_space<vmem>>, %arg2: memref<42x18xf32, #tpu.memory_space<vmem>>, %arg3: memref<26x2xf32, #tpu.memory_space<vmem>>) attributes {dimension_semantics = [#tpu.dimension_semantics<parallel>], iteration_bounds = array<i64: 1>, scalar_prefetch = 0 : i64, scratch_operands = 0 : i64, tpu.core_type = #tpu.core_type<tc>, window_params = [{transform_indices = @transform_0, window_bounds = array<i64: 8, 2>}, {pipeline_mode = #tpu.pipeline_mode<synchronous>, transform_indices = @transform_1, window_bounds = array<i64: 42, 18>}, {transform_indices = @transform_2, window_bounds = array<i64: 26, 2>}]} {
    %c0 = arith.constant 0 : index
    %c0_0 = arith.constant 0 : index
    %0 = vector.load %arg2[%c0, %c0_0] : memref<42x18xf32, #tpu.memory_space<vmem>>, vector<16x16xf32>
    %c16 = arith.constant 16 : index
    %c0_1 = arith.constant 0 : index
    %1 = vector.load %arg2[%c16, %c0_1] : memref<42x18xf32, #tpu.memory_space<vmem>>, vector<26x16xf32>
    %c0_2 = arith.constant 0 : index
    %c16_3 = arith.constant 16 : index
    %2 = vector.load %arg2[%c0_2, %c16_3] : memref<42x18xf32, #tpu.memory_space<vmem>>, vector<16x1xf32>
    %c0_4 = arith.constant 0 : index
    %c17 = arith.constant 17 : index
    %3 = vector.load %arg2[%c0_4, %c17] : memref<42x18xf32, #tpu.memory_space<vmem>>, vector<16x1xf32>
    %c16_5 = arith.constant 16 : index
    %c16_6 = arith.constant 16 : index
    %4 = vector.load %arg2[%c16_5, %c16_6] : memref<42x18xf32, #tpu.memory_space<vmem>>, vector<26x1xf32>
    %c0_7 = arith.constant 0 : index
    %c0_8 = arith.constant 0 : index
    %5 = vector.load %arg1[%c0_7, %c0_8] : memref<8x2xf32, #tpu.memory_space<vmem>>, vector<1x2xf32>
    %6 = vector.broadcast %5 : vector<1x2xf32> to vector<16x2xf32>
    %7 = vector.broadcast %2 : vector<16x1xf32> to vector<16x2xf32>
    %8 = arith.mulf %6, %7 : vector<16x2xf32>
    %9 = vector.broadcast %3 : vector<16x1xf32> to vector<16x2xf32>
    %10 = arith.addf %8, %9 : vector<16x2xf32>
    %11 = math.tanh %10 : vector<16x2xf32>
    %c1 = arith.constant 1 : index
    %c0_9 = arith.constant 0 : index
    %12 = vector.load %arg1[%c1, %c0_9] : memref<8x2xf32, #tpu.memory_space<vmem>>, vector<1x2xf32>
    %13 = vector.broadcast %12 : vector<1x2xf32> to vector<16x2xf32>
    %14 = vector.broadcast %2 : vector<16x1xf32> to vector<16x2xf32>
    %15 = arith.mulf %13, %14 : vector<16x2xf32>
    %16 = vector.broadcast %3 : vector<16x1xf32> to vector<16x2xf32>
    %17 = arith.addf %15, %16 : vector<16x2xf32>
    %cst = arith.constant dense<0.000000e+00> : vector<16x2xf32>
    %18 = tpu.matmul %0, %11, %cst {dimension_numbers = #tpu.dot_dimension_numbers<[1], [0], [0], [1], [0, 0, 1, 1], [], []>} : vector<16x16xf32>, vector<16x2xf32>, vector<16x2xf32> -> vector<16x2xf32>
    %19 = arith.addf %17, %18 : vector<16x2xf32>
    %20 = math.tanh %19 : vector<16x2xf32>
    %c2 = arith.constant 2 : index
    %c0_10 = arith.constant 0 : index
    %21 = vector.load %arg1[%c2, %c0_10] : memref<8x2xf32, #tpu.memory_space<vmem>>, vector<1x2xf32>
    %22 = vector.broadcast %21 : vector<1x2xf32> to vector<16x2xf32>
    %23 = vector.broadcast %2 : vector<16x1xf32> to vector<16x2xf32>
    %24 = arith.mulf %22, %23 : vector<16x2xf32>
    %25 = vector.broadcast %3 : vector<16x1xf32> to vector<16x2xf32>
    %26 = arith.addf %24, %25 : vector<16x2xf32>
    %cst_11 = arith.constant dense<0.000000e+00> : vector<16x2xf32>
    %27 = tpu.matmul %0, %20, %cst_11 {dimension_numbers = #tpu.dot_dimension_numbers<[1], [0], [0], [1], [0, 0, 1, 1], [], []>} : vector<16x16xf32>, vector<16x2xf32>, vector<16x2xf32> -> vector<16x2xf32>
    %28 = arith.addf %26, %27 : vector<16x2xf32>
    %29 = math.tanh %28 : vector<16x2xf32>
    %c3 = arith.constant 3 : index
    %c0_12 = arith.constant 0 : index
    %30 = vector.load %arg1[%c3, %c0_12] : memref<8x2xf32, #tpu.memory_space<vmem>>, vector<1x2xf32>
    %31 = vector.broadcast %30 : vector<1x2xf32> to vector<16x2xf32>
    %32 = vector.broadcast %2 : vector<16x1xf32> to vector<16x2xf32>
    %33 = arith.mulf %31, %32 : vector<16x2xf32>
    %34 = vector.broadcast %3 : vector<16x1xf32> to vector<16x2xf32>
    %35 = arith.addf %33, %34 : vector<16x2xf32>
    %cst_13 = arith.constant dense<0.000000e+00> : vector<16x2xf32>
    %36 = tpu.matmul %0, %29, %cst_13 {dimension_numbers = #tpu.dot_dimension_numbers<[1], [0], [0], [1], [0, 0, 1, 1], [], []>} : vector<16x16xf32>, vector<16x2xf32>, vector<16x2xf32> -> vector<16x2xf32>
    %37 = arith.addf %35, %36 : vector<16x2xf32>
    %38 = math.tanh %37 : vector<16x2xf32>
    %c4 = arith.constant 4 : index
    %c0_14 = arith.constant 0 : index
    %39 = vector.load %arg1[%c4, %c0_14] : memref<8x2xf32, #tpu.memory_space<vmem>>, vector<1x2xf32>
    %40 = vector.broadcast %39 : vector<1x2xf32> to vector<16x2xf32>
    %41 = vector.broadcast %2 : vector<16x1xf32> to vector<16x2xf32>
    %42 = arith.mulf %40, %41 : vector<16x2xf32>
    %43 = vector.broadcast %3 : vector<16x1xf32> to vector<16x2xf32>
    %44 = arith.addf %42, %43 : vector<16x2xf32>
    %cst_15 = arith.constant dense<0.000000e+00> : vector<16x2xf32>
    %45 = tpu.matmul %0, %38, %cst_15 {dimension_numbers = #tpu.dot_dimension_numbers<[1], [0], [0], [1], [0, 0, 1, 1], [], []>} : vector<16x16xf32>, vector<16x2xf32>, vector<16x2xf32> -> vector<16x2xf32>
    %46 = arith.addf %44, %45 : vector<16x2xf32>
    %47 = math.tanh %46 : vector<16x2xf32>
    %c5 = arith.constant 5 : index
    %c0_16 = arith.constant 0 : index
    %48 = vector.load %arg1[%c5, %c0_16] : memref<8x2xf32, #tpu.memory_space<vmem>>, vector<1x2xf32>
    %49 = vector.broadcast %48 : vector<1x2xf32> to vector<16x2xf32>
    %50 = vector.broadcast %2 : vector<16x1xf32> to vector<16x2xf32>
    %51 = arith.mulf %49, %50 : vector<16x2xf32>
    %52 = vector.broadcast %3 : vector<16x1xf32> to vector<16x2xf32>
    %53 = arith.addf %51, %52 : vector<16x2xf32>
    %cst_17 = arith.constant dense<0.000000e+00> : vector<16x2xf32>
    %54 = tpu.matmul %0, %47, %cst_17 {dimension_numbers = #tpu.dot_dimension_numbers<[1], [0], [0], [1], [0, 0, 1, 1], [], []>} : vector<16x16xf32>, vector<16x2xf32>, vector<16x2xf32> -> vector<16x2xf32>
    %55 = arith.addf %53, %54 : vector<16x2xf32>
    %56 = math.tanh %55 : vector<16x2xf32>
    %c6 = arith.constant 6 : index
    %c0_18 = arith.constant 0 : index
    %57 = vector.load %arg1[%c6, %c0_18] : memref<8x2xf32, #tpu.memory_space<vmem>>, vector<1x2xf32>
    %58 = vector.broadcast %57 : vector<1x2xf32> to vector<16x2xf32>
    %59 = vector.broadcast %2 : vector<16x1xf32> to vector<16x2xf32>
    %60 = arith.mulf %58, %59 : vector<16x2xf32>
    %61 = vector.broadcast %3 : vector<16x1xf32> to vector<16x2xf32>
    %62 = arith.addf %60, %61 : vector<16x2xf32>
    %cst_19 = arith.constant dense<0.000000e+00> : vector<16x2xf32>
    %63 = tpu.matmul %0, %56, %cst_19 {dimension_numbers = #tpu.dot_dimension_numbers<[1], [0], [0], [1], [0, 0, 1, 1], [], []>} : vector<16x16xf32>, vector<16x2xf32>, vector<16x2xf32> -> vector<16x2xf32>
    %64 = arith.addf %62, %63 : vector<16x2xf32>
    %65 = math.tanh %64 : vector<16x2xf32>
    %c7 = arith.constant 7 : index
    %c0_20 = arith.constant 0 : index
    %66 = vector.load %arg1[%c7, %c0_20] : memref<8x2xf32, #tpu.memory_space<vmem>>, vector<1x2xf32>
    %67 = vector.broadcast %66 : vector<1x2xf32> to vector<16x2xf32>
    %68 = vector.broadcast %2 : vector<16x1xf32> to vector<16x2xf32>
    %69 = arith.mulf %67, %68 : vector<16x2xf32>
    %70 = vector.broadcast %3 : vector<16x1xf32> to vector<16x2xf32>
    %71 = arith.addf %69, %70 : vector<16x2xf32>
    %cst_21 = arith.constant dense<0.000000e+00> : vector<16x2xf32>
    %72 = tpu.matmul %0, %65, %cst_21 {dimension_numbers = #tpu.dot_dimension_numbers<[1], [0], [0], [1], [0, 0, 1, 1], [], []>} : vector<16x16xf32>, vector<16x2xf32>, vector<16x2xf32> -> vector<16x2xf32>
    %73 = arith.addf %71, %72 : vector<16x2xf32>
    %74 = math.tanh %73 : vector<16x2xf32>
    %cst_22 = arith.constant dense<0.000000e+00> : vector<26x2xf32>
    %75 = tpu.matmul %1, %74, %cst_22 {dimension_numbers = #tpu.dot_dimension_numbers<[1], [0], [0], [1], [0, 0, 1, 1], [], []>} : vector<26x16xf32>, vector<16x2xf32>, vector<26x2xf32> -> vector<26x2xf32>
    %76 = vector.broadcast %4 : vector<26x1xf32> to vector<26x2xf32>
    %77 = arith.addf %75, %76 : vector<26x2xf32>
    %c0_23 = arith.constant 0 : index
    %c0_24 = arith.constant 0 : index
    %78 = vector.load %arg3[%c0_23, %c0_24] : memref<26x2xf32, #tpu.memory_space<vmem>>, vector<26x2xf32>
    tpu.vector_store %arg3[%c0_23, %c0_24], %77 {strides = array<i32>} : memref<26x2xf32, #tpu.memory_space<vmem>>, vector<26x2xf32>,
    return
  }
  func.func @transform_0(%arg0: i32) -> (i32, i32) {
    %c0_i32 = arith.constant 0 : i32
    %c0_i32_0 = arith.constant 0 : i32
    return %c0_i32, %arg0 : i32, i32
  }
  func.func @transform_1(%arg0: i32) -> (i32, i32) {
    %c0_i32 = arith.constant 0 : i32
    %c0_i32_0 = arith.constant 0 : i32
    %c0_i32_1 = arith.constant 0 : i32
    return %c0_i32, %c0_i32_0 : i32, i32
  }
  func.func @transform_2(%arg0: i32) -> (i32, i32) {
    %c0_i32 = arith.constant 0 : i32
    %c0_i32_0 = arith.constant 0 : i32
    return %c0_i32, %arg0 : i32, i32
  }
}

</mosaic_0001>

<bundles_post_ra>
// kernel: tpu_custom_call.1
= control target key start
LH: loop header
LB: loop body
LE: loop exit
PB: predicated region body
PF: predicated region fallthrough
CT: control target
= control target key end

     0   :  { %v412_v0 = vmov 17   ;;  %v413_v1 = vmov 16   ;;  %vm49_vm0 = vcmask 130048   ;;  %vm336_vm1 = vcmask 15360   ;;  %s579_s1 = inlined_call_operand.vmem [shape: f32[42,18], index: 1, kind: input, shape index: {}]   ;;  %s580_s0 = inlined_call_operand.vmem [shape: f32[8,2], index: 0, kind: input, shape index: {}]   ;;  %s581_s2 = inlined_call_operand.vmem [shape: f32[26,2], index: 2, kind: output, shape index: {}]  }
   0x1   :  { %369 = vset.pattern.permute.xlu1 %v412_v0  ;;  %368 = vset.pattern.permute.xlu0 %v413_v1  ;;  %v432_v2 = vld [vmem:[%s579_s1 + $0x8] sm:$0xff]  ;;  %v439_v3 = vld [vmem:[%s579_s1] sm:$0xff]  ;;  %vm340_vm2 = vcmask 9216  }
   0x2   :  { %36 = vperm.xlu1 %369, %v432_v2   ;;  %26 = vperm.xlu0 %368, %v432_v2   ;;  %v446_v4 = vld [vmem:[%s579_s1 + $0x20] sm:$0xff] }
   0x3   :  { %370 = vset.pattern.permute.xlu2 %v413_v1  ;;  %v372_v5 = vld [vmem:[%s580_s0] ss:$0 sm:$0xff]  ;;  %v373_v6 = vld [vmem:[%s580_s0 + $0x1] ss:$0 sm:$0xff]  ;;  %v374_v7 = vld [vmem:[%s580_s0 + $0x2] ss:$0 sm:$0xff] }
   0x4   :  { %v461_v8 = vld [vmem:[%s580_s0 + $0x3] ss:$0 sm:$0xff]  ;;  %v466_v9 = vld [vmem:[%s580_s0 + $0x4] ss:$0 sm:$0xff]  ;;  %v471_v10 = vld [vmem:[%s580_s0 + $0x5] ss:$0 sm:$0xff] }
   0x5   :  { %v476_v11 = vld [vmem:[%s580_s0 + $0x6] ss:$0 sm:$0xff]  ;;  %v481_v12 = vld [vmem:[%s580_s0 + $0x7] ss:$0 sm:$0xff] }
   0xa   :  { %32 = vperm.xlu1 %369, %v439_v3   ;;  %21 = vperm.xlu0 %368, %v439_v3  }
  0x12   :  { %291 = vperm.xlu0 %368, %v446_v4   ;;  %371 = vset.pattern.permute.xlu1 %v413_v1 }
  0x74   :  { %v37_v13 = vpop.permute.xlu1 %36  ;;  %v27_v14 = vpop.permute.xlu0 %26 }
  0x75   :  { %v30_v15 = vmul.f32 %v372_v5, %v27_v14  ;;  %v46_v16 = vmul.f32 %v373_v6, %v27_v14  ;;  %v84_v17 = vmul.f32 %v374_v7, %v27_v14  ;;  %v117_v18 = vmul.f32 %v461_v8, %v27_v14 }
  0x76   :  { %v150_v19 = vmul.f32 %v466_v9, %v27_v14  ;;  %v183_v20 = vmul.f32 %v471_v10, %v27_v14  ;;  %v216_v21 = vmul.f32 %v476_v11, %v27_v14  ;;  %v249_v22 = vmul.f32 %v481_v12, %v27_v14 }
  0x77   :  { %v40_v23 = vadd.f32 %v37_v13, %v30_v15  ;;  %v48_v24 = vadd.f32 %v46_v16, %v37_v13  ;;  %v86_v25 = vadd.f32 %v84_v17, %v37_v13  ;;  %v119_v26 = vadd.f32 %v117_v18, %v37_v13 }
  0x78   :  { %v488_v27 = vadd.f32 %v150_v19, %v37_v13  ;;  %v490_v28 = vadd.f32 %v183_v20, %v37_v13  ;;  %v492_v29 = vadd.f32 %v216_v21, %v37_v13  ;;  %v494_v30 = vadd.f32 %v249_v22, %v37_v13 }
  0x79   :  { %380 = vtanh.f32 %v40_v23 }
  0x7c   :  { %v496_v31 = vpop.permute.xlu0 %21  ;;  %v499_v33 = vpop.permute.xlu1 %32 }
  0x7d   :  { %v29_v32 = vmul.f32 %v372_v5, %v496_v31  ;;  %v45_v38 = vmul.f32 %v373_v6, %v496_v31  ;;  %v83_v46 = vmul.f32 %v374_v7, %v496_v31  ;;  %v116_v54 = vmul.f32 %v461_v8, %v496_v31 }
  0x7e   :  { %v149_v61 = vmul.f32 %v466_v9, %v496_v31  ;;  %v182_v9 = vmul.f32 %v471_v10, %v496_v31  ;;  %v215_v10 = vmul.f32 %v476_v11, %v496_v31  ;;  %v13_v11 = vld [vmem:[%s579_s1 + $0x10] sm:$0xff] }
  0x7f   :  { %v381_v34 = vpop.eup %380  ;;  %v39_v35 = vadd.f32 %v499_v33, %v29_v32  ;;  %v47_v39 = vadd.f32 %v45_v38, %v499_v33  ;;  %v85_v47 = vadd.f32 %v83_v46, %v499_v33  ;;  %v118_v55 = vadd.f32 %v116_v54, %v499_v33  ;;  %281 = vperm.xlu2 %370, %v13_v11  }
  0x80   :  { %68 = vmatpush.msra.mxu0 %v381_v34  ;;  %v151_v63 = vadd.f32 %v149_v61, %v499_v33  ;;  %v184_v13 = vadd.f32 %v182_v9, %v499_v33  ;;  %v217_v20 = vadd.f32 %v215_v10, %v499_v33 }
  0x81   :  { %382 = vtanh.f32 %v39_v35 }
  0x87   :  { %v383_v36 = vpop.eup %382 }
  0x88   :  { %69 = vmatpush.msra.mxu0 %v383_v36 }
  0x89   :  { %346 = vmatmul.msk.f32.vlgmr.msra.gmra.mxu0 %vm49_vm0, %v439_v3 }
  0x91   :  { %347 = vmatmul.msk.f32.gmra.mxu0 %vm49_vm0, %v432_v2 }
 0x106   :  { %v71_v37 = vpop.f32.mrf.mxu0 }
 0x107   :  { %v77_v41 = vadd.f32 %v71_v37, %v47_v39  ;;  %v292_v39 = vpop.permute.xlu0 %291 }
 0x10e   :  { %v74_v40 = vpop.f32.mrf.mxu0 }
 0x10f   :  { %v78_v42 = vadd.f32 %v74_v40, %v48_v24 }
 0x111   :  { %384 = vtanh.f32 %v78_v42 }
 0x112   :  { %386 = vtanh.f32 %v77_v41 }
 0x117   :  { %v385_v43 = vpop.eup %384 }
 0x118   :  { %101 = vmatpush.msra.mxu1 %v385_v43  ;;  %v387_v44 = vpop.eup %386 }
 0x11a   :  { %102 = vmatpush.msra.mxu1 %v387_v44 }
 0x11b   :  { %348 = vmatmul.msk.f32.vlgmr.msra.gmra.mxu1 %vm49_vm0, %v439_v3 }
 0x123   :  { %349 = vmatmul.msk.f32.gmra.mxu1 %vm49_vm0, %v432_v2 }
 0x198   :  { %v104_v45 = vpop.f32.mrf.mxu1 }
 0x199   :  { %v110_v49 = vadd.f32 %v104_v45, %v85_v47 }
 0x1a0   :  { %v107_v48 = vpop.f32.mrf.mxu1 }
 0x1a1   :  { %v111_v50 = vadd.f32 %v107_v48, %v86_v25 }
 0x1a3   :  { %388 = vtanh.f32 %v111_v50 }
 0x1a4   :  { %390 = vtanh.f32 %v110_v49 }
 0x1a9   :  { %v389_v51 = vpop.eup %388 }
 0x1aa   :  { %134 = vmatpush.msra.mxu2 %v389_v51  ;;  %v391_v52 = vpop.eup %390 }
 0x1ac   :  { %135 = vmatpush.msra.mxu2 %v391_v52 }
 0x1ad   :  { %350 = vmatmul.msk.f32.vlgmr.msra.gmra.mxu2 %vm49_vm0, %v439_v3 }
 0x1b5   :  { %351 = vmatmul.msk.f32.gmra.mxu2 %vm49_vm0, %v432_v2 }
 0x230   :  { %v137_v53 = vpop.f32.mrf.mxu2 }
 0x231   :  { %v143_v57 = vadd.f32 %v137_v53, %v118_v55 }
 0x238   :  { %v140_v56 = vpop.f32.mrf.mxu2 }
 0x239   :  { %v144_v58 = vadd.f32 %v140_v56, %v119_v26  ;;  %v14_v26 = vld [vmem:[%s579_s1 + $0x18] sm:$0xff] }
 0x23a   :  { %286 = vperm.xlu2 %370, %v14_v26  }
 0x23b   :  { %392 = vtanh.f32 %v144_v58 }
 0x23c   :  { %394 = vtanh.f32 %v143_v57 }
 0x241   :  { %v393_v59 = vpop.eup %392 }
 0x242   :  { %167 = vmatpush.msrb.mxu0 %v393_v59  ;;  %364 = vmatpush.msra.mxu3 %v393_v59  ;;  %v395_v60 = vpop.eup %394 }
 0x244   :  { %168 = vmatpush.msrb.mxu0 %v395_v60  ;;  %365 = vmatpush.msra.mxu3 %v395_v60 }
 0x245   :  { %352 = vmatmul.msk.f32.vlgmr.msrb.gmra.mxu0 %vm49_vm0, %v439_v3  ;;  %353 = vmatmul.msk.f32.vlgmr.msra.gmra.mxu3 %vm49_vm0, %v432_v2 }
 0x2c2   :  { %v170_v62 = vpop.f32.mrf.mxu0 }
 0x2c3   :  { %v176_v1 = vadd.f32 %v170_v62, %v151_v63 }
 0x2c8   :  { %v173_v0 = vpop.f32.mrf.mxu3 }
 0x2c9   :  { %v177_v5 = vadd.f32 %v173_v0, %v488_v27 }
 0x2cb   :  { %396 = vtanh.f32 %v177_v5 }
 0x2cc   :  { %398 = vtanh.f32 %v176_v1 }
 0x2d1   :  { %v397_v6 = vpop.eup %396 }
 0x2d2   :  { %200 = vmatpush.msra.mxu0 %v397_v6  ;;  %v399_v7 = vpop.eup %398 }
 0x2d4   :  { %201 = vmatpush.msra.mxu0 %v399_v7 }
 0x2d5   :  { %354 = vmatmul.msk.f32.vlgmr.msra.gmra.mxu0 %vm49_vm0, %v439_v3 }
 0x2dd   :  { %355 = vmatmul.msk.f32.gmra.mxu0 %vm49_vm0, %v432_v2 }
 0x352   :  { %v203_v8 = vpop.f32.mrf.mxu0 }
 0x353   :  { %v209_v15 = vadd.f32 %v203_v8, %v184_v13 }
 0x35a   :  { %v206_v14 = vpop.f32.mrf.mxu0 }
 0x35b   :  { %v210_v16 = vadd.f32 %v206_v14, %v490_v28  ;;  %v248_v28 = vmul.f32 %v481_v12, %v496_v31  ;;  %v282_v12 = vpop.permute.xlu2 %281 }
 0x35d   :  { %400 = vtanh.f32 %v210_v16 }
 0x35e   :  { %402 = vtanh.f32 %v209_v15 }
 0x363   :  { %v401_v17 = vpop.eup %400 }
 0x364   :  { %233 = vmatpush.msrb.mxu1 %v401_v17  ;;  %v403_v18 = vpop.eup %402 }
 0x366   :  { %234 = vmatpush.msrb.mxu1 %v403_v18 }
 0x367   :  { %356 = vmatmul.msk.f32.vlgmr.msrb.gmra.mxu1 %vm49_vm0, %v439_v3 }
 0x36f   :  { %357 = vmatmul.msk.f32.gmra.mxu1 %vm49_vm0, %v432_v2 }
 0x3e4   :  { %v236_v19 = vpop.f32.mrf.mxu1 }
 0x3e5   :  { %v242_v22 = vadd.f32 %v236_v19, %v217_v20 }
 0x3ec   :  { %v239_v21 = vpop.f32.mrf.mxu1 }
 0x3ed   :  { %v243_v23 = vadd.f32 %v239_v21, %v492_v29 }
 0x3ef   :  { %404 = vtanh.f32 %v243_v23 }
 0x3f0   :  { %406 = vtanh.f32 %v242_v22 }
 0x3f5   :  { %v405_v24 = vpop.eup %404 }
 0x3f6   :  { %266 = vmatpush.msrb.mxu2 %v405_v24  ;;  %v407_v25 = vpop.eup %406 }
 0x3f8   :  { %267 = vmatpush.msrb.mxu2 %v407_v25 }
 0x3f9   :  { %358 = vmatmul.msk.f32.vlgmr.msrb.gmra.mxu2 %vm49_vm0, %v439_v3  ;;  %v16_v3 = vld [vmem:[%s579_s1 + $0x28] sm:$0x3] }
 0x3fa   :  { %296 = vperm.xlu1 %371, %v16_v3  }
 0x401   :  { %359 = vmatmul.msk.f32.gmra.mxu2 %vm49_vm0, %v432_v2  ;;  %v250_v2 = vadd.f32 %v248_v28, %v499_v33 }
 0x46c   :  { %v297_v41 = vpop.permute.xlu1 %296 }
 0x47c   :  { %v269_v27 = vpop.f32.mrf.mxu2 }
 0x47d   :  { %v275_v32 = vadd.f32 %v269_v27, %v250_v2 }
 0x484   :  { %v272_v29 = vpop.f32.mrf.mxu2 }
 0x485   :  { %v276_v34 = vadd.f32 %v272_v29, %v494_v30  ;;  %v287_v30 = vpop.permute.xlu2 %286 }
 0x487   :  { %408 = vtanh.f32 %v276_v34 }
 0x488   :  { %410 = vtanh.f32 %v275_v32 }
 0x48d   :  { %v409_v35 = vpop.eup %408 }
 0x48e   :  { %321 = vmatpush.msrb.mxu3 %v409_v35  ;;  %v411_v36 = vpop.eup %410 }
 0x490   :  { %322 = vmatpush.msrb.mxu3 %v411_v36 }
 0x491   :  { %360 = vmatmul.msk.f32.vlgmr.msrb.gmra.mxu3 %vm49_vm0, %v13_v11 }
 0x499   :  { %361 = vmatmul.msk.f32.gmra.mxu3 %vm49_vm0, %v14_v26 }
 0x4a1   :  { %362 = vmatmul.msk.f32.gmra.mxu3 %vm49_vm0, %v446_v4 }
 0x4a9   :  { %363 = vmatmul.msk.f32.gmra.mxu3 %vm49_vm0, %v16_v3 }
 0x514   :  { %v324_v31 = vpop.f32.mrf.mxu3 }
 0x515   :  { %v325_v33 = vadd.f32 %v324_v31, %v282_v12 }
 0x517   :  { %337 = vst.msk [vmem:[%s581_s2] sm:$0xff] %vm336_vm1, %v325_v33 }
 0x51c   :  { %v327_v37 = vpop.f32.mrf.mxu3 }
 0x51d   :  { %v328_v38 = vadd.f32 %v327_v37, %v287_v30 }
 0x51f   :  { %338 = vst.msk [vmem:[%s581_s2 + $0x8] sm:$0xff] %vm336_vm1, %v328_v38 }
 0x524   :  { %v330_v40 = vpop.f32.mrf.mxu3 }
 0x525   :  { %v331_v4 = vadd.f32 %v330_v40, %v292_v39 }
 0x527   :  { %339 = vst.msk [vmem:[%s581_s2 + $0x10] sm:$0xff] %vm336_vm1, %v331_v4 }
 0x52c   :  { %v333_v42 = vpop.f32.mrf.mxu3 }
 0x52d   :  { %v334_v43 = vadd.f32 %v333_v42, %v297_v41 }
 0x52f   :  { %341 = vst.msk [vmem:[%s581_s2 + $0x18] sm:$0x3] %vm340_vm2, %v334_v43 }

</bundles_post_ra>
